<compile_context>
chip_gen: v6e
topology: v6e:2x2x1
jax: 0.10.0
libtpu: 0.0.40
codegen_flags: <defaults>
</compile_context>

<pallas_src>
import functools

import jax
import jax.numpy as jnp
from jax.experimental import pallas as pl
from jax.experimental.pallas import tpu as pltpu

LANE = 128  # TPU lane width


def _round_up(n, m):
    return ((n + m - 1) // m) * m


def _sublane(dtype):
    # Packed sub-32-bit dtypes need taller sublane multiples (fp32:8, bf16:16, int8:32).
    return max(8, 32 // jnp.dtype(dtype).itemsize)


def mlp_kernel(x_ref, w1_ref, b1_ref, w2_ref, b2_ref, o_ref):
    # Cast the activation tile to bf16 in-kernel (VPU, co-issues under DMA);
    # weights arrive already in bf16.  Accumulation stays f32.
    x = x_ref[...].astype(jnp.bfloat16)

    # fc1: (tb, F) @ (F, H_pad) + (1, H_pad), then ReLU (f32 epilogue).
    h = jnp.dot(x, w1_ref[...], preferred_element_type=jnp.float32)
    h = jnp.maximum(h + b1_ref[...], 0.0)

    # fc2: (tb, H_pad) @ (H_pad, C_pad) + (1, C_pad).  Lane-dense output block.
    out = jnp.dot(h.astype(jnp.bfloat16), w2_ref[...],
                  preferred_element_type=jnp.float32)
    o_ref[...] = out + b2_ref[...]


def prepare_params(w1, b1, w2, b2):
    """One-time weight prep: lane-pad hidden/class axes to 128 and cast weights to
    bf16.  Call once and reuse across forward calls (hoisted out of the hot path)."""
    F, Hdim = w1.shape
    C = w2.shape[1]
    H_pad = _round_up(Hdim, LANE)
    C_pad = _round_up(C, LANE)
    w1_p = jnp.zeros((F, H_pad), jnp.bfloat16).at[:, :Hdim].set(w1.astype(jnp.bfloat16))
    b1_p = jnp.zeros((1, H_pad), jnp.float32).at[:, :Hdim].set(
        b1.reshape(1, -1).astype(jnp.float32))
    w2_p = jnp.zeros((H_pad, C_pad), jnp.bfloat16).at[:Hdim, :C].set(
        w2.astype(jnp.bfloat16))
    b2_p = jnp.zeros((1, C_pad), jnp.float32).at[:, :C].set(
        b2.reshape(1, -1).astype(jnp.float32))
    return w1_p, b1_p, w2_p, b2_p


def lit_classifier_forward(x, w1_p, b1_p, w2_p, b2_p, *, num_classes, tile_b=512):
    """x: (B, C, H, W) any float/int dtype (bf16/uint8 welcome — halves/quarters HBM
    traffic).  Params must come from prepare_params().  Returns (B, num_classes)
    float32 logits."""
    B = x.shape[0]
    x_flat = x.reshape(B, -1)          # caller dtype; bf16 cast happens in-kernel
    F = x_flat.shape[1]
    H_pad = w1_p.shape[1]
    C_pad = w2_p.shape[1]

    # Batch tile selection.
    sub = _sublane(x_flat.dtype)
    if B <= 2 * sub:
        # Tiny batch: one block spanning the full batch dim (always a legal block).
        tb = B
    else:
        # At least two tiles (v7x megacore), sublane-aligned, capped at tile_b.
        tb = min(_round_up(tile_b, sub), _round_up(pl.cdiv(B, 2), sub))
    grid = (pl.cdiv(B, tb),)           # ragged final tile handled as boundary block

    # VMEM budget: x double buffer + out double buffer + resident weights/biases.
    vmem_bytes = (2 * tb * F * x_flat.dtype.itemsize
                  + 2 * tb * C_pad * 4
                  + F * H_pad * 2 + H_pad * C_pad * 2
                  + (H_pad + C_pad) * 4)
    vmem_limit = None
    if vmem_bytes > (24 << 20):
        # Only raise above the scoped default; stay well under v7x's 64 MiB physical.
        vmem_limit = min(int(vmem_bytes * 1.25) + (2 << 20), 56 << 20)

    out = pl.pallas_call(
        mlp_kernel,
        out_shape=jax.ShapeDtypeStruct((B, C_pad), jnp.float32),
        grid=grid,
        in_specs=[
            pl.BlockSpec((tb, F), lambda i: (i, 0)),         # x: tiled over batch
            pl.BlockSpec((F, H_pad), lambda i: (0, 0)),      # w1: VMEM-resident
            pl.BlockSpec((1, H_pad), lambda i: (0, 0)),      # b1: VMEM-resident
            pl.BlockSpec((H_pad, C_pad), lambda i: (0, 0)),  # w2: VMEM-resident
            pl.BlockSpec((1, C_pad), lambda i: (0, 0)),      # b2: VMEM-resident
        ],
        out_specs=pl.BlockSpec((tb, C_pad), lambda i: (i, 0)),
        compiler_params=pltpu.CompilerParams(
            dimension_semantics=("parallel",),               # batch tiles across TCs
            vmem_limit_bytes=vmem_limit,
        ),
    )(x_flat, w1_p, b1_p, w2_p, b2_p)

    return out[:, :num_classes]


def init_params(key, input_size, hidden_size, num_classes):
    """Deterministic synthetic init (uniform, roughly PyTorch Linear's scale).
    Weights are stored transposed: (in_features, out_features)."""
    k1, k2, k3, k4 = jax.random.split(key, 4)
    lim1 = 1.0 / jnp.sqrt(input_size)
    lim2 = 1.0 / jnp.sqrt(hidden_size)
    w1 = jax.random.uniform(k1, (input_size, hidden_size), jnp.float32, -lim1, lim1)
    b1 = jax.random.uniform(k2, (hidden_size,), jnp.float32, -lim1, lim1)
    w2 = jax.random.uniform(k3, (hidden_size, num_classes), jnp.float32, -lim2, lim2)
    b2 = jax.random.uniform(k4, (num_classes,), jnp.float32, -lim2, lim2)
    return w1, b1, w2, b2


def _references(x, w1, b1, w2, b2):
    B = x.shape[0]
    x_flat = x.reshape(B, -1).astype(jnp.float32)
    # Same precision policy as the kernel (bf16 MXU inputs, f32 accumulate).
    h = jnp.dot(x_flat.astype(jnp.bfloat16), w1.astype(jnp.bfloat16),
                preferred_element_type=jnp.float32) + b1
    h = jnp.maximum(h, 0.0)
    ref_bf16 = jnp.dot(h.astype(jnp.bfloat16), w2.astype(jnp.bfloat16),
                       preferred_element_type=jnp.float32) + b2
    # Exact PyTorch fp32 semantics.
    ref_f32 = jnp.maximum(x_flat @ w1 + b1, 0.0) @ w2 + b2
    return ref_bf16, ref_f32


if __name__ == "__main__":
    key = jax.random.PRNGKey(0)
    k_x, k_x2, k_p = jax.random.split(key, 3)

    # Small MNIST-like config: 1 channel, 16x16 images -> input_size=256.
    C_in, Himg, Wimg = 1, 16, 16
    input_size = C_in * Himg * Wimg
    hidden_size = 32
    num_classes = 10

    w1, b1, w2, b2 = init_params(k_p, input_size, hidden_size, num_classes)
    params = prepare_params(w1, b1, w2, b2)   # padded/cast once, reused below

    fwd = jax.jit(functools.partial(lit_classifier_forward, num_classes=num_classes))

    # Case 1: tiny batch (single full-batch block).
    B1 = 2
    x1 = jax.random.normal(k_x, (B1, C_in, Himg, Wimg), jnp.float32)
    logits1 = fwd(x1, *params)
    jax.block_until_ready(logits1)
    assert logits1.shape == (B1, num_classes)
    ref_bf16, ref_f32 = _references(x1, w1, b1, w2, b2)
    assert jnp.allclose(logits1, ref_bf16, atol=1e-3, rtol=1e-3)
    assert jnp.allclose(logits1, ref_f32, atol=1e-1, rtol=1e-1)

    # Case 2: moderate batch exercising the multi-tile + ragged boundary-block path
    # (no wrapper-side padding of x).
    B2 = 200
    x2 = jax.random.normal(k_x2, (B2, C_in, Himg, Wimg), jnp.float32)
    logits2 = fwd(x2, *params)
    jax.block_until_ready(logits2)
    assert logits2.shape == (B2, num_classes)
    ref_bf16_2, ref_f32_2 = _references(x2, w1, b1, w2, b2)
    assert jnp.allclose(logits2, ref_bf16_2, atol=1e-3, rtol=1e-3)
    assert jnp.allclose(logits2, ref_f32_2, atol=1e-1, rtol=1e-1)

    # TODO(synk): training_step / validation metrics (loss, Accuracy) are not part of
    # the forward pass and are not translated.
    print("KERNEL_OK")
</pallas_src>

<mosaic_0001>
module attributes {stable_mosaic.version = 11 : i64} {
  func.func @mlp_kernel(%arg0: i32, %arg1: memref<2x256xf32, #tpu.memory_space<vmem>>, %arg2: memref<256x128xbf16, #tpu.memory_space<vmem>>, %arg3: memref<1x128xf32, #tpu.memory_space<vmem>>, %arg4: memref<128x128xbf16, #tpu.memory_space<vmem>>, %arg5: memref<1x128xf32, #tpu.memory_space<vmem>>, %arg6: memref<2x128xf32, #tpu.memory_space<vmem>>) attributes {dimension_semantics = [#tpu.dimension_semantics<parallel>], iteration_bounds = array<i64: 1>, scalar_prefetch = 0 : i64, scratch_operands = 0 : i64, tpu.core_type = #tpu.core_type<tc>, window_params = [{transform_indices = @transform_0, window_bounds = array<i64: 2, 256>}, {pipeline_mode = #tpu.pipeline_mode<synchronous>, transform_indices = @transform_1, window_bounds = array<i64: 256, 128>}, {pipeline_mode = #tpu.pipeline_mode<synchronous>, transform_indices = @transform_2, window_bounds = array<i64: 1, 128>}, {pipeline_mode = #tpu.pipeline_mode<synchronous>, transform_indices = @transform_3, window_bounds = array<i64: 128, 128>}, {pipeline_mode = #tpu.pipeline_mode<synchronous>, transform_indices = @transform_4, window_bounds = array<i64: 1, 128>}, {transform_indices = @transform_5, window_bounds = array<i64: 2, 128>}]} {
    %c0 = arith.constant 0 : index
    %c0_0 = arith.constant 0 : index
    %0 = vector.load %arg1[%c0, %c0_0] : memref<2x256xf32, #tpu.memory_space<vmem>>, vector<2x256xf32>
    %1 = arith.truncf %0 : vector<2x256xf32> to vector<2x256xbf16>
    %c0_1 = arith.constant 0 : index
    %c0_2 = arith.constant 0 : index
    %2 = vector.load %arg2[%c0_1, %c0_2] : memref<256x128xbf16, #tpu.memory_space<vmem>>, vector<256x128xbf16>
    %cst = arith.constant dense<0.000000e+00> : vector<2x128xf32>
    %3 = tpu.matmul %1, %2, %cst {dimension_numbers = #tpu.dot_dimension_numbers<[1], [0], [0], [1], [0, 0, 1, 1], [], []>} : vector<2x256xbf16>, vector<256x128xbf16>, vector<2x128xf32> -> vector<2x128xf32>
    %c0_3 = arith.constant 0 : index
    %c0_4 = arith.constant 0 : index
    %4 = vector.load %arg3[%c0_3, %c0_4] : memref<1x128xf32, #tpu.memory_space<vmem>>, vector<1x128xf32>
    %5 = vector.broadcast %4 : vector<1x128xf32> to vector<2x128xf32>
    %6 = arith.addf %3, %5 : vector<2x128xf32>
    %cst_5 = arith.constant 0.000000e+00 : f32
    %7 = vector.broadcast %cst_5 : f32 to vector<2x128xf32>
    %8 = arith.maximumf %6, %7 : vector<2x128xf32>
    %9 = arith.truncf %8 : vector<2x128xf32> to vector<2x128xbf16>
    %c0_6 = arith.constant 0 : index
    %c0_7 = arith.constant 0 : index
    %10 = vector.load %arg4[%c0_6, %c0_7] : memref<128x128xbf16, #tpu.memory_space<vmem>>, vector<128x128xbf16>
    %cst_8 = arith.constant dense<0.000000e+00> : vector<2x128xf32>
    %11 = tpu.matmul %9, %10, %cst_8 {dimension_numbers = #tpu.dot_dimension_numbers<[1], [0], [0], [1], [0, 0, 1, 1], [], []>} : vector<2x128xbf16>, vector<128x128xbf16>, vector<2x128xf32> -> vector<2x128xf32>
    %c0_9 = arith.constant 0 : index
    %c0_10 = arith.constant 0 : index
    %12 = vector.load %arg5[%c0_9, %c0_10] : memref<1x128xf32, #tpu.memory_space<vmem>>, vector<1x128xf32>
    %13 = vector.broadcast %12 : vector<1x128xf32> to vector<2x128xf32>
    %14 = arith.addf %11, %13 : vector<2x128xf32>
    %c0_11 = arith.constant 0 : index
    %c0_12 = arith.constant 0 : index
    %15 = vector.load %arg6[%c0_11, %c0_12] : memref<2x128xf32, #tpu.memory_space<vmem>>, vector<2x128xf32>
    tpu.vector_store %arg6[%c0_11, %c0_12], %14 {strides = array<i32>} : memref<2x128xf32, #tpu.memory_space<vmem>>, vector<2x128xf32>,
    return
  }
  func.func @transform_0(%arg0: i32) -> (i32, i32) {
    %c0_i32 = arith.constant 0 : i32
    %c0_i32_0 = arith.constant 0 : i32
    return %arg0, %c0_i32 : i32, i32
  }
  func.func @transform_1(%arg0: i32) -> (i32, i32) {
    %c0_i32 = arith.constant 0 : i32
    %c0_i32_0 = arith.constant 0 : i32
    %c0_i32_1 = arith.constant 0 : i32
    return %c0_i32, %c0_i32_0 : i32, i32
  }
  func.func @transform_2(%arg0: i32) -> (i32, i32) {
    %c0_i32 = arith.constant 0 : i32
    %c0_i32_0 = arith.constant 0 : i32
    %c0_i32_1 = arith.constant 0 : i32
    return %c0_i32, %c0_i32_0 : i32, i32
  }
  func.func @transform_3(%arg0: i32) -> (i32, i32) {
    %c0_i32 = arith.constant 0 : i32
    %c0_i32_0 = arith.constant 0 : i32
    %c0_i32_1 = arith.constant 0 : i32
    return %c0_i32, %c0_i32_0 : i32, i32
  }
  func.func @transform_4(%arg0: i32) -> (i32, i32) {
    %c0_i32 = arith.constant 0 : i32
    %c0_i32_0 = arith.constant 0 : i32
    %c0_i32_1 = arith.constant 0 : i32
    return %c0_i32, %c0_i32_0 : i32, i32
  }
  func.func @transform_5(%arg0: i32) -> (i32, i32) {
    %c0_i32 = arith.constant 0 : i32
    %c0_i32_0 = arith.constant 0 : i32
    return %arg0, %c0_i32 : i32, i32
  }
}

</mosaic_0001>

<bundles_post_ra>
// kernel: lit_classifier_forward.1
= control target key start
LH: loop header
LB: loop body
LE: loop exit
PB: predicated region body
PF: predicated region fallthrough
CT: control target
= control target key end

     0   :  { %10 = vsyncpa [#allocation3], 0  ;;  %s608_s0 = inlined_call_operand.vmem [shape: f32[2,256], index: 0, kind: input, shape index: {}]   ;;  %s609_s1 = inlined_call_operand.hbm [shape: bf16[256,128], index: 1, kind: input, shape index: {}]   ;;  %s610_s2 = inlined_call_operand.vmem [shape: f32[1,128], index: 2, kind: input, shape index: {}]   ;;  %s611_s3 = inlined_call_operand.hbm [shape: bf16[128,128], index: 3, kind: input, shape index: {}]   ;;  %s612_s4 = inlined_call_operand.vmem [shape: f32[1,128], index: 4, kind: input, shape index: {}]   ;;  %s613_s5 = inlined_call_operand.hbm [shape: f32[2,128], index: 5, kind: output, shape index: {}]  }
   0x1   :  { %11 = vsyncpa [#allocation6], 0 }
   0x2   :  { %12 = vsyncpa [#allocation4], 0  ;;  %s544_s18 = smov [#allocation2]  }
   0x3   :  { %s20_s19 = sshll.u32 %s544_s18, 4  ;;  %s21_s19 = int_to_ptr.vmem [resolvable:$true] %s20_s19 }
   0x4   :  { %s486_s20 = scalar_lea.vmem %s21_s19, 2048  ;;  %p491_p1 = scmp.lt.s32.totalorder %s21_s19, %s21_s19 }
   0x5   :  { %p487_p0 = scmp.ne.s32.totalorder %s21_s19, %s486_s20  ;;  %p492_p2 = scmp.lt.s32.totalorder %s486_s20, %s486_s20 }
   0x7   :  { %p493_p3 = por %p492_p2, %p491_p1 }
   0x9   :  { %p494_p4 = pnand %p493_p3, %p487_p0 }
   0xb   :  { %497 = shalt.err (!%p494_p4)
}
   0xc   :  { %s545_s21 = smov 64   ;;  %s546_s22 = smov 4  }
   0xd   :  { %26 = dma.hbm_to_vmem [thread:$0]  %s609_s1, 2048, %s21_s19, [#allocation3], %s545_s21, %s545_s21, %s546_s22  }
   0xe   :  { %s547_s25 = smov [#allocation5]  }
   0xf   :  { %s34_s26 = sshll.u32 %s547_s25, 4  ;;  %s35_s26 = int_to_ptr.vmem [resolvable:$true] %s34_s26 }
  0x10   :  { %s506_s27 = scalar_lea.vmem %s35_s26, 1024  ;;  %p511_p6 = scmp.lt.s32.totalorder %s35_s26, %s35_s26 }
  0x11   :  { %p507_p5 = scmp.ne.s32.totalorder %s35_s26, %s506_s27  ;;  %p512_p7 = scmp.lt.s32.totalorder %s506_s27, %s506_s27 }
  0x13   :  { %p513_p8 = por %p512_p7, %p511_p6 }
  0x15   :  { %p514_p9 = pnand %p513_p8, %p507_p5 }
  0x17   :  { %517 = shalt.err (!%p514_p9)
}
  0x18   :  { %40 = dma.hbm_to_vmem [thread:$0]  %s611_s3, 1024, %s35_s26, [#allocation6], %s545_s21, %s545_s21, %s546_s22  }
  0x19   :  { %538 = dma.done.wait [#allocation3], 2048  }
  0x1a   :  { %539 = vsyncadd [#allocation3], 4294965248 }
  0x1b   :  { %540 = dma.done.wait [#allocation6], 1024  }
  0x1c   :  { %541 = vsyncadd [#allocation6], 4294966272  ;;  %v548_v0 = vmov 0.0   ;;  %v454_v1 = vld [vmem:[#allocation2 + $0x78] sm:$0xff]   ;;  %v456_v3 = vld [vmem:[#allocation2 + $0x70] sm:$0xff]   ;;  %vm549_vm0 = vmmov 0  }
  0x1d   :  { %427 = vmatprep.subr.bf16.mxu1 %v548_v0  ;;  %v455_v2 = vld [vmem:[#allocation2 + $0x38] sm:$0xff]   ;;  %396 = vmatprep.subr.bf16.mxu0 %v454_v1  ;;  %v457_v4 = vld [vmem:[#allocation2 + $0x30] sm:$0xff]   ;;  %v458_v5 = vld [vmem:[#allocation2 + $0x68] sm:$0xff]   ;;  %s550_s8 = smov [#allocation7]  }
  0x1e   :  { %397 = vmatpush3.bf16.msra.mxu0 %v455_v2  ;;  %v459_v6 = vld [vmem:[#allocation2 + $0x28] sm:$0xff]   ;;  %v460_v7 = vld [vmem:[#allocation2 + $0x60] sm:$0xff]   ;;  %v462_v9 = vld [vmem:[#allocation2 + $0x58] sm:$0xff]   ;;  %443 = vmatprep.mubr.msk.bf16.mxu1 %vm549_vm0, %v548_v0  ;;  %s359_s9 = sshll.u32 %s550_s8, 4  ;;  %s360_s9 = int_to_ptr.vmem [resolvable:$true] %s359_s9 }
  0x1f   :  { %398 = vmatprep.subr.bf16.mxu0 %v456_v3  ;;  %v461_v8 = vld [vmem:[#allocation2 + $0x20] sm:$0xff]   ;;  %v463_v10 = vld [vmem:[#allocation2 + $0x18] sm:$0xff]   ;;  %v464_v11 = vld [vmem:[#allocation2 + $0x50] sm:$0xff]   ;;  %p523_p11 = scmp.lt.s32.totalorder %s360_s9, %s360_s9 }
  0x20   :  { %v369_v12 = vld.sshfl [vmem:[%s608_s0] sm:$0x33 pattern:$0x76325410]  ;;  %v470_v14 = vld [vmem:[#allocation5 + $0x38] sm:$0xff]   ;;  %v465_v15 = vld [vmem:[#allocation2 + $0x10] sm:$0xff]  }
  0x21   :  { %v59_v13 = vcombine.high %v369_v12, %v369_v12  ;;  %428 = vmatpush3.bf16.msra.mxu1 %v470_v14  ;;  %v471_v17 = vld [vmem:[#allocation5 + $0x30] sm:$0xff]   ;;  %v466_v18 = vld [vmem:[#allocation2 + $0x48] sm:$0xff]   ;;  %v468_v21 = vld [vmem:[#allocation2 + $0x40] sm:$0xff]   ;;  %v62_v24 = vpack.c.bf16 %v369_v12, %v369_v12 }
  0x22   :  { %399 = vmatpush3.bf16.msra.mxu0 %v457_v4  ;;  %429 = vmatprep.subr.bf16.mxu1 %v548_v0  ;;  %v467_v19 = vld [vmem:[#allocation2 + $0x8] sm:$0xff]   ;;  %v469_v22 = vld [vmem:[#allocation2] sm:$0xff]   ;;  %v474_v25 = vld [vmem:[#allocation5 + $0x18] sm:$0xff]  }
  0x23   :  { %400 = vmatprep.subr.bf16.mxu0 %v458_v5  ;;  %v63_v16 = vpack.c.bf16 %v59_v13, %v59_v13  ;;  %v472_v20 = vld [vmem:[#allocation5 + $0x28] sm:$0xff]   ;;  %v473_v23 = vld [vmem:[#allocation5 + $0x20] sm:$0xff]   ;;  %v475_v26 = vld [vmem:[#allocation5 + $0x10] sm:$0xff]  }
  0x24   :  { %v476_v27 = vld [vmem:[#allocation5 + $0x8] sm:$0xff]   ;;  %v477_v28 = vld [vmem:[#allocation5] sm:$0xff]  }
  0x25   :  { %231 = vmatprep.mubr.bf16.mxu0 %v63_v16  ;;  %430 = vmatpush3.bf16.msra.mxu1 %v471_v17  ;;  %v370_v30 = vld [vmem:[%s610_s2] ss:$0 sm:$0xff]  ;;  %s518_s2 = scalar_lea.vmem %s360_s9, 32 }
  0x26   :  { %401 = vmatpush3.bf16.msra.mxu0 %v459_v6  ;;  %431 = vmatprep.subr.bf16.mxu1 %v548_v0  ;;  %v387_v38 = vld [vmem:[%s612_s4] ss:$0 sm:$0xff]  ;;  %p519_p10 = scmp.ne.s32.totalorder %s360_s9, %s518_s2  ;;  %p524_p12 = scmp.lt.s32.totalorder %s518_s2, %s518_s2 }
  0x27   :  { %402 = vmatprep.subr.bf16.mxu0 %v460_v7 }
  0x28   :  { %p525_p13 = por %p524_p12, %p523_p11 }
  0x29   :  { %432 = vmatpush3.bf16.msra.mxu1 %v472_v20 }
  0x2a   :  { %403 = vmatpush3.bf16.msra.mxu0 %v461_v8  ;;  %433 = vmatprep.subr.bf16.mxu1 %v548_v0  ;;  %p526_p0 = pnand %p525_p13, %p519_p10 }
  0x2b   :  { %404 = vmatprep.subr.bf16.mxu0 %v462_v9 }
  0x2d   :  { %434 = vmatpush3.bf16.msra.mxu1 %v473_v23 }
  0x2e   :  { %405 = vmatpush3.bf16.msra.mxu0 %v463_v10  ;;  %435 = vmatprep.subr.bf16.mxu1 %v548_v0 }
  0x2f   :  { %406 = vmatprep.subr.bf16.mxu0 %v464_v11 }
  0x31   :  { %436 = vmatpush3.bf16.msra.mxu1 %v474_v25 }
  0x32   :  { %407 = vmatpush3.bf16.msra.mxu0 %v465_v15  ;;  %437 = vmatprep.subr.bf16.mxu1 %v548_v0 }
  0x33   :  { %408 = vmatprep.subr.bf16.mxu0 %v466_v18 }
  0x35   :  { %438 = vmatpush3.bf16.msra.mxu1 %v475_v26 }
  0x36   :  { %409 = vmatpush3.bf16.msra.mxu0 %v467_v19  ;;  %439 = vmatprep.subr.bf16.mxu1 %v548_v0 }
  0x37   :  { %410 = vmatprep.subr.bf16.mxu0 %v468_v21 }
  0x39   :  { %440 = vmatpush3.bf16.msra.mxu1 %v476_v27 }
  0x3a   :  { %411 = vmatpush3.bf16.msra.mxu0 %v469_v22  ;;  %441 = vmatprep.subr.bf16.mxu1 %v548_v0 }
  0x3d   :  { %232 = vmatmul.mubr.bf16.vlgmr.msra.gmra.mxu0 %v62_v24  ;;  %442 = vmatpush3.bf16.msra.mxu1 %v477_v28 }
  0xfd   :  { %v412_v29 = vpop.f32.mrf.mxu0 }
  0xff   :  { %v413_v31 = vpop.f32.mrf.mxu0 }
 0x100   :  { %v414_v32 = vadd.f32 %v413_v31, %v412_v29 }
 0x101   :  { %v415_v33 = vpop.f32.mrf.mxu0 }
 0x102   :  { %v234_v34 = vadd.f32 %v414_v32, %v370_v30 }
 0x103   :  { %v416_v35 = vpop.f32.mrf.mxu0 }
 0x104   :  { %v239_v36 = vmax.f32 %v234_v34, 0.0 }
 0x106   :  { %v240_v37 = vpack.c.bf16 %v239_v36, %v239_v36 }
 0x108   :  { %444 = vmatmul.mubr.bf16.vlgmr.msra.gmra.mxu1 %v240_v37 }
 0x1c8   :  { %v346_v39 = vpop.f32.mrf.mxu1 }
 0x1c9   :  { %v347_v40 = vadd.f32 %v387_v38, %v346_v39 }
 0x1ca   :  { %v445_v41 = vpop.f32.mrf.mxu1 }
 0x1cb   :  { %352 = vst [vmem:[#allocation7] sm:$0x3] %v347_v40 }
 0x1cc   :  { %v349_v42 = vpop.f32.mrf.mxu1 }
 0x1cd   :  { %529 = shalt.err (!%p526_p0)
}
 0x1ce   :  { %362 = dma.vmem_to_hbm [thread:$0]  %s360_s9, 32, %s613_s5, [#allocation4]   ;;  %v446_v43 = vpop.f32.mrf.mxu1 }
 0x1cf   :  { %542 = dma.done.wait [#allocation4], 32  }
 0x1d0   :  { %543 = vsyncadd [#allocation4], 4294967264 }
 0x1d1   :  { %366 = vsyncpa [#allocation3], 1 }
 0x1d2   :  { %367 = vsyncpa [#allocation6], 1 }
 0x1d3   :  { %368 = vsyncpa [#allocation4], 1 }

</bundles_post_ra>
